<compile_context>
chip_gen: v7x
topology: tpu7x:2x2x1
jax: 0.10.0
libtpu: 0.0.40
codegen_flags: <defaults>
</compile_context>

<pallas_src>
import functools

import jax
import jax.numpy as jnp
from jax.experimental import pallas as pl
from jax.experimental.pallas import tpu as pltpu

_LANE = 128      # TPU lane width (last-dim granule)
_SUB = 16        # sublane granule (bf16-safe; multiple of 8 for f32)
_TB_MAX = 512    # max batch-tile rows per grid step (memory-bound sweet spot)


def _round_up(n, m):
    return ((n + m - 1) // m) * m


def _pick_batch_tile(b):
    """Largest tile <= _TB_MAX that still gives >=2 grid steps when possible
    (so the 'parallel' batch axis can use both TensorCores on v7x)."""
    tb = _round_up(max(1, -(-b // 2)), _SUB)      # round_up(cdiv(b, 2), 16)
    return max(_SUB, min(_TB_MAX, tb))


def _mlp_kernel(x_ref, w1_ref, b1_ref, w2_ref, b2_ref, out_ref):
    """Fused  pred = relu(x @ W1 + b1) @ W2 + b2  on one (TB, D) batch tile.

    x:  (TB, D)  f32 (cast to bf16 in-register)   w1: (D, Hp)  bf16
    b1: (1, Hp)  f32                              w2: (Hp, Cp) bf16
    b2: (1, Cp)  f32                              out: (TB, Cp) f32
    """
    x = x_ref[...].astype(jnp.bfloat16)                       # in-kernel cast
    h = jnp.dot(x, w1_ref[...],
                preferred_element_type=jnp.float32)           # MXU, f32 acc
    h = jnp.maximum(h + b1_ref[...], 0.0)                     # VPU f32 epilogue
    o = jnp.dot(h.astype(jnp.bfloat16), w2_ref[...],
                preferred_element_type=jnp.float32)           # MXU, f32 acc
    out_ref[...] = o + b2_ref[...]


def prepare_params(w1, b1, w2, b2):
    """One-time weight prep: zero-pad hidden/class dims to 128 lanes and cast
    MXU operands to bf16.  Do this at init, NOT per forward call."""
    D, Hid = w1.shape
    NumCls = w2.shape[1]
    Hp = _round_up(Hid, _LANE)
    Cp = _round_up(NumCls, _LANE)
    w1_p = jnp.zeros((D, Hp), jnp.bfloat16).at[:, :Hid].set(w1.astype(jnp.bfloat16))
    b1_p = jnp.zeros((1, Hp), jnp.float32).at[:, :Hid].set(b1.astype(jnp.float32))
    w2_p = jnp.zeros((Hp, Cp), jnp.bfloat16).at[:Hid, :NumCls].set(w2.astype(jnp.bfloat16))
    b2_p = jnp.zeros((1, Cp), jnp.float32).at[:, :NumCls].set(b2.astype(jnp.float32))
    return {"w1": w1_p, "b1": b1_p, "w2": w2_p, "b2": b2_p}


@functools.partial(jax.jit, static_argnames=("num_classes",))
def pallas_forward(x_nchw, params, *, num_classes):
    """Forward pass of the concrete AbstractPyTorchNetwork instantiation.

    Args:
      x_nchw:      (B, C, H, W) float32 input batch (PyTorch NCHW convention).
      params:      dict from `prepare_params` (pre-padded bf16/f32 weights).
      num_classes: true (unpadded) number of output classes.

    Returns:
      dict with key 'pred': (B, num_classes) float32 logits.
    """
    w1_p, b1_p = params["w1"], params["b1"]
    w2_p, b2_p = params["w2"], params["b2"]
    B = x_nchw.shape[0]
    D, Hp = w1_p.shape
    Cp = w2_p.shape[1]

    # Glue: flatten NCHW -> (B, D); same row-major semantics as x.view(B, -1).
    x2d = x_nchw.reshape(B, -1).astype(jnp.float32)
    assert x2d.shape[1] == D, "flattened input dim must match W1 rows"

    tb = _pick_batch_tile(B)

    # Grid over batch tiles (cdiv -> partial last block handled by Pallas).
    # Activations are pipelined (auto double-buffered DMA); weights/biases
    # keep a constant block index so they stay VMEM-resident.
    pred_p = pl.pallas_call(
        _mlp_kernel,
        out_shape=jax.ShapeDtypeStruct((B, Cp), jnp.float32),
        grid_spec=pl.GridSpec(
            grid=(pl.cdiv(B, tb),),
            in_specs=[
                pl.BlockSpec((tb, D), lambda i: (i, 0)),    # activations
                pl.BlockSpec((D, Hp), lambda i: (0, 0)),    # W1 (resident)
                pl.BlockSpec((1, Hp), lambda i: (0, 0)),    # b1 (resident)
                pl.BlockSpec((Hp, Cp), lambda i: (0, 0)),   # W2 (resident)
                pl.BlockSpec((1, Cp), lambda i: (0, 0)),    # b2 (resident)
            ],
            out_specs=pl.BlockSpec((tb, Cp), lambda i: (i, 0)),
        ),
        compiler_params=pltpu.CompilerParams(
            dimension_semantics=("parallel",)),   # batch tiles -> v7x megacore
    )(x2d, w1_p, b1_p, w2_p, b2_p)

    # Strip class-lane padding (tiny (B, NumCls) slice).
    return {"pred": pred_p[:, :num_classes]}


def _init_params(key, d_in, hidden, num_classes):
    """Deterministic synthetic parameter init (no checkpoint loading)."""
    k1, k2, k3, k4 = jax.random.split(key, 4)
    w1 = jax.random.normal(k1, (d_in, hidden), jnp.float32) * 0.02
    b1 = jax.random.normal(k2, (1, hidden), jnp.float32) * 0.02
    w2 = jax.random.normal(k3, (hidden, num_classes), jnp.float32) * 0.02
    b2 = jax.random.normal(k4, (1, num_classes), jnp.float32) * 0.02
    return w1, b1, w2, b2


if __name__ == "__main__":
    key = jax.random.PRNGKey(0)
    kx, kp = jax.random.split(key)

    # Small shapes consistent with an image-classification forward.
    B, C, H, W = 2, 4, 16, 16
    D = C * H * W          # 1024
    HIDDEN = 32
    NUM_CLASSES = 10

    x = jax.random.normal(kx, (B, C, H, W), jnp.float32)
    w1, b1, w2, b2 = _init_params(kp, D, HIDDEN, NUM_CLASSES)

    params = prepare_params(w1, b1, w2, b2)   # one-time pad+cast (not per call)

    out = pallas_forward(x, params, num_classes=NUM_CLASSES)
    pred = jax.block_until_ready(out["pred"])
    assert pred.shape == (B, NUM_CLASSES)

    # Reference with the SAME bf16-operand / f32-accumulate arithmetic.
    xb = x.reshape(B, D).astype(jnp.bfloat16)
    h_ref = jnp.dot(xb, w1.astype(jnp.bfloat16),
                    preferred_element_type=jnp.float32) + b1
    h_ref = jnp.maximum(h_ref, 0.0)
    ref = jnp.dot(h_ref.astype(jnp.bfloat16), w2.astype(jnp.bfloat16),
                  preferred_element_type=jnp.float32) + b2
    assert jnp.allclose(pred, ref, atol=1e-2, rtol=1e-2)

    # Sanity vs full-f32 math (loose tolerance: intentional bf16 MXU operands).
    ref_f32 = jnp.maximum(x.reshape(B, D) @ w1 + b1, 0.0) @ w2 + b2
    assert jnp.allclose(pred, ref_f32, atol=5e-2, rtol=5e-2)

    print("KERNEL_OK")
</pallas_src>

<mosaic_0001>
module attributes {stable_mosaic.version = 11 : i64} {
  func.func @_mlp_kernel(%arg0: i32, %arg1: memref<16x1024xf32, #tpu.memory_space<vmem>>, %arg2: memref<1024x128xbf16, #tpu.memory_space<vmem>>, %arg3: memref<1x128xf32, #tpu.memory_space<vmem>>, %arg4: memref<128x128xbf16, #tpu.memory_space<vmem>>, %arg5: memref<1x128xf32, #tpu.memory_space<vmem>>, %arg6: memref<16x128xf32, #tpu.memory_space<vmem>>) attributes {dimension_semantics = [#tpu.dimension_semantics<parallel>], iteration_bounds = array<i64: 1>, scalar_prefetch = 0 : i64, scratch_operands = 0 : i64, tpu.core_type = #tpu.core_type<tc>, window_params = [{transform_indices = @transform_0, window_bounds = array<i64: 16, 1024>}, {pipeline_mode = #tpu.pipeline_mode<synchronous>, transform_indices = @transform_1, window_bounds = array<i64: 1024, 128>}, {pipeline_mode = #tpu.pipeline_mode<synchronous>, transform_indices = @transform_2, window_bounds = array<i64: 1, 128>}, {pipeline_mode = #tpu.pipeline_mode<synchronous>, transform_indices = @transform_3, window_bounds = array<i64: 128, 128>}, {pipeline_mode = #tpu.pipeline_mode<synchronous>, transform_indices = @transform_4, window_bounds = array<i64: 1, 128>}, {transform_indices = @transform_5, window_bounds = array<i64: 16, 128>}]} {
    %c0 = arith.constant 0 : index
    %c0_0 = arith.constant 0 : index
    %0 = vector.load %arg1[%c0, %c0_0] : memref<16x1024xf32, #tpu.memory_space<vmem>>, vector<16x1024xf32>
    %1 = arith.truncf %0 : vector<16x1024xf32> to vector<16x1024xbf16>
    %c0_1 = arith.constant 0 : index
    %c0_2 = arith.constant 0 : index
    %2 = vector.load %arg2[%c0_1, %c0_2] : memref<1024x128xbf16, #tpu.memory_space<vmem>>, vector<1024x128xbf16>
    %cst = arith.constant dense<0.000000e+00> : vector<16x128xf32>
    %3 = tpu.matmul %1, %2, %cst {dimension_numbers = #tpu.dot_dimension_numbers<[1], [0], [0], [1], [0, 0, 1, 1], [], []>} : vector<16x1024xbf16>, vector<1024x128xbf16>, vector<16x128xf32> -> vector<16x128xf32>
    %c0_3 = arith.constant 0 : index
    %c0_4 = arith.constant 0 : index
    %4 = vector.load %arg3[%c0_3, %c0_4] : memref<1x128xf32, #tpu.memory_space<vmem>>, vector<1x128xf32>
    %5 = vector.broadcast %4 : vector<1x128xf32> to vector<16x128xf32>
    %6 = arith.addf %3, %5 : vector<16x128xf32>
    %cst_5 = arith.constant 0.000000e+00 : f32
    %7 = vector.broadcast %cst_5 : f32 to vector<16x128xf32>
    %8 = arith.maximumf %6, %7 : vector<16x128xf32>
    %9 = arith.truncf %8 : vector<16x128xf32> to vector<16x128xbf16>
    %c0_6 = arith.constant 0 : index
    %c0_7 = arith.constant 0 : index
    %10 = vector.load %arg4[%c0_6, %c0_7] : memref<128x128xbf16, #tpu.memory_space<vmem>>, vector<128x128xbf16>
    %cst_8 = arith.constant dense<0.000000e+00> : vector<16x128xf32>
    %11 = tpu.matmul %9, %10, %cst_8 {dimension_numbers = #tpu.dot_dimension_numbers<[1], [0], [0], [1], [0, 0, 1, 1], [], []>} : vector<16x128xbf16>, vector<128x128xbf16>, vector<16x128xf32> -> vector<16x128xf32>
    %c0_9 = arith.constant 0 : index
    %c0_10 = arith.constant 0 : index
    %12 = vector.load %arg5[%c0_9, %c0_10] : memref<1x128xf32, #tpu.memory_space<vmem>>, vector<1x128xf32>
    %13 = vector.broadcast %12 : vector<1x128xf32> to vector<16x128xf32>
    %14 = arith.addf %11, %13 : vector<16x128xf32>
    %c0_11 = arith.constant 0 : index
    %c0_12 = arith.constant 0 : index
    %15 = vector.load %arg6[%c0_11, %c0_12] : memref<16x128xf32, #tpu.memory_space<vmem>>, vector<16x128xf32>
    tpu.vector_store %arg6[%c0_11, %c0_12], %14 {strides = array<i32>} : memref<16x128xf32, #tpu.memory_space<vmem>>, vector<16x128xf32>,
    return
  }
  func.func @transform_0(%arg0: i32) -> (i32, i32) {
    %c0_i32 = arith.constant 0 : i32
    %c0_i32_0 = arith.constant 0 : i32
    return %arg0, %c0_i32 : i32, i32
  }
  func.func @transform_1(%arg0: i32) -> (i32, i32) {
    %c0_i32 = arith.constant 0 : i32
    %c0_i32_0 = arith.constant 0 : i32
    %c0_i32_1 = arith.constant 0 : i32
    return %c0_i32, %c0_i32_0 : i32, i32
  }
  func.func @transform_2(%arg0: i32) -> (i32, i32) {
    %c0_i32 = arith.constant 0 : i32
    %c0_i32_0 = arith.constant 0 : i32
    %c0_i32_1 = arith.constant 0 : i32
    return %c0_i32, %c0_i32_0 : i32, i32
  }
  func.func @transform_3(%arg0: i32) -> (i32, i32) {
    %c0_i32 = arith.constant 0 : i32
    %c0_i32_0 = arith.constant 0 : i32
    %c0_i32_1 = arith.constant 0 : i32
    return %c0_i32, %c0_i32_0 : i32, i32
  }
  func.func @transform_4(%arg0: i32) -> (i32, i32) {
    %c0_i32 = arith.constant 0 : i32
    %c0_i32_0 = arith.constant 0 : i32
    %c0_i32_1 = arith.constant 0 : i32
    return %c0_i32, %c0_i32_0 : i32, i32
  }
  func.func @transform_5(%arg0: i32) -> (i32, i32) {
    %c0_i32 = arith.constant 0 : i32
    %c0_i32_0 = arith.constant 0 : i32
    return %arg0, %c0_i32 : i32, i32
  }
}

</mosaic_0001>

<bundles_post_ra>
// kernel: pallas_forward.1
= control target key start
LH: loop header
LB: loop body
LE: loop exit
PB: predicated region body
PF: predicated region fallthrough
CT: control target
= control target key end

     0   :  { %10 = vsyncpa [#allocation3], 0  ;;  %s1556_s0 = inlined_call_operand.vmem [shape: f32[2,1024], index: 0, kind: input, shape index: {}]   ;;  %s1557_s1 = inlined_call_operand.hbm [shape: bf16[1024,128], index: 1, kind: input, shape index: {}]   ;;  %s1558_s2 = inlined_call_operand.vmem [shape: f32[1,128], index: 2, kind: input, shape index: {}]   ;;  %s1559_s3 = inlined_call_operand.vmem [shape: bf16[128,128], index: 3, kind: input, shape index: {}]   ;;  %s1560_s4 = inlined_call_operand.vmem [shape: f32[1,128], index: 4, kind: input, shape index: {}]   ;;  %s1561_s5 = inlined_call_operand.hbm [shape: f32[2,128], index: 5, kind: output, shape index: {}]  }
   0x1   :  { %11 = vsyncpa [#allocation4], 0  ;;  %s1397_s18 = smov [#allocation2]   ;;  %s1349_s22 = scalar_lea.hbm %s1557_s1, 8192 }
   0x2   :  { %s19_s19 = sshll.u32 %s1397_s18, 4  ;;  %p1350_p0 = scmp.ne.s32.totalorder %s1557_s1, %s1349_s22  ;;  %s20_s19 = int_to_ptr.vmem [resolvable:$true] %s19_s19 }
   0x3   :  { %p1353_p1 = scmp.lt.u32.totalorder %s1349_s22, %s1557_s1 }
   0x5   :  { %p1355_p2 = pnand %p1353_p1, %p1350_p0 }
   0x7   :  { %1358 = shalt.err (!%p1355_p2)
}
   0x8   :  { %s1359_s27 = scalar_lea.vmem %s20_s19, 8192  ;;  %p1364_p4 = scmp.lt.s32.totalorder %s20_s19, %s20_s19 }
   0x9   :  { %p1360_p3 = scmp.ne.s32.totalorder %s20_s19, %s1359_s27  ;;  %p1365_p5 = scmp.lt.s32.totalorder %s1359_s27, %s1359_s27 }
   0xb   :  { %p1366_p6 = por %p1365_p5, %p1364_p4 }
   0xd   :  { %p1367_p7 = pnand %p1366_p6, %p1360_p3 }
   0xf   :  { %1370 = shalt.err (!%p1367_p7)
}
  0x10   :  { %s1398_s28 = smov 64   ;;  %s1399_s29 = smov 4  }
  0x11   :  { %25 = dma.hbm_to_vmem [thread:$0]  %s1557_s1, 8192, %s20_s19, [#allocation3], %s1398_s28, %s1398_s28, %s1399_s29  }
  0x12   :  { %1393 = dma.done.wait [#allocation3], 8192  }
  0x13   :  { %1394 = vsyncadd [#allocation3], 4294959104  ;;  %v1253_v0 = vld [vmem:[#allocation2 + $0x40] sm:$0xff]   ;;  %v1257_v4 = vld [vmem:[#allocation2 + $0x48] sm:$0xff]   ;;  %v1400_v25 = vmov 1983009808   ;;  %v75_v27 = vlaneseq }
  0x14   :  { %v1254_v1 = vld [vmem:[#allocation2 + $0xc0] sm:$0xff]   ;;  %1127 = vmatprep.subr.bf16.mxu0 %v1253_v0  ;;  %v1258_v5 = vld [vmem:[#allocation2 + $0xc8] sm:$0xff]   ;;  %v1261_v8 = vld [vmem:[#allocation2 + $0x50] sm:$0xff]   ;;  %v73_v26 = vunpack.c.l.s4 %v1400_v25  ;;  %vm1402_vm0 = vmmov 0  }
  0x15   :  { %v1255_v2 = vld [vmem:[#allocation2] sm:$0xff]   ;;  %1149 = vmatprep.subr.bf16.mxu1 %v1254_v1  ;;  %v1259_v6 = vld [vmem:[#allocation2 + $0x8] sm:$0xff]   ;;  %v1262_v9 = vld [vmem:[#allocation2 + $0xd0] sm:$0xff]   ;;  %v76_v33 = vshrl.u32 %v75_v27, 7 }
  0x16   :  { %v1256_v3 = vld [vmem:[#allocation2 + $0x80] sm:$0xff]   ;;  %1128 = vmatpush3.bf16.msra.mxu0 %v1255_v2  ;;  %v1260_v7 = vld [vmem:[#allocation2 + $0x88] sm:$0xff]   ;;  %v1263_v10 = vld [vmem:[#allocation2 + $0x10] sm:$0xff]   ;;  %v74_v32 = vunpack.c.0.s8 %v73_v26 }
  0x17   :  { %1150 = vmatpush3.bf16.msra.mxu1 %v1256_v3  ;;  %1129 = vmatprep.subr.bf16.mxu0 %v1257_v4  ;;  %v1264_v11 = vld [vmem:[#allocation2 + $0x90] sm:$0xff]   ;;  %v1265_v12 = vld [vmem:[#allocation2 + $0x58] sm:$0xff]   ;;  %v1269_v16 = vld [vmem:[#allocation2 + $0x60] sm:$0xff]  }
  0x18   :  { %1151 = vmatprep.subr.bf16.mxu1 %v1258_v5  ;;  %v1266_v13 = vld [vmem:[#allocation2 + $0xd8] sm:$0xff]   ;;  %v1270_v17 = vld [vmem:[#allocation2 + $0xe0] sm:$0xff]   ;;  %v1273_v20 = vld [vmem:[#allocation2 + $0x68] sm:$0xff]   ;;  %v1448_v37 = vsub.s32 %v74_v32, %v76_v33 }
  0x19   :  { %v1267_v14 = vld [vmem:[#allocation2 + $0x18] sm:$0xff]   ;;  %v1271_v18 = vld [vmem:[#allocation2 + $0x20] sm:$0xff]   ;;  %v1274_v21 = vld [vmem:[#allocation2 + $0xe8] sm:$0xff]  }
  0x1a   :  { %1130 = vmatpush3.bf16.msra.mxu0 %v1259_v6  ;;  %v1268_v15 = vld [vmem:[#allocation2 + $0x98] sm:$0xff]   ;;  %v1272_v19 = vld [vmem:[#allocation2 + $0xa0] sm:$0xff]   ;;  %v1275_v22 = vld [vmem:[#allocation2 + $0x28] sm:$0xff]  }
  0x1b   :  { %1152 = vmatpush3.bf16.msra.mxu1 %v1260_v7  ;;  %1131 = vmatprep.subr.bf16.mxu0 %v1261_v8  ;;  %v1276_v23 = vld [vmem:[#allocation2 + $0xa8] sm:$0xff]   ;;  %v1277_v24 = vld [vmem:[#allocation2 + $0x70] sm:$0xff]   ;;  %v1281_v31 = vld [vmem:[#allocation2 + $0x78] sm:$0xff]  }
  0x1c   :  { %1153 = vmatprep.subr.bf16.mxu1 %v1262_v9  ;;  %v1278_v28 = vld [vmem:[#allocation2 + $0xf0] sm:$0xff]   ;;  %v1282_v34 = vld [vmem:[#allocation2 + $0xf8] sm:$0xff]   ;;  %v1297_v53 = vld [vmem:[#allocation2 + $0x140] sm:$0xff]  }
  0x1d   :  { %v1279_v29 = vld [vmem:[#allocation2 + $0x30] sm:$0xff]   ;;  %v1283_v35 = vld [vmem:[#allocation2 + $0x38] sm:$0xff]   ;;  %v1298_v58 = vld [vmem:[#allocation2 + $0x1c0] sm:$0xff]  }
  0x1e   :  { %1132 = vmatpush3.bf16.msra.mxu0 %v1263_v10  ;;  %v1280_v30 = vld [vmem:[#allocation2 + $0xb0] sm:$0xff]   ;;  %v1284_v36 = vld [vmem:[#allocation2 + $0xb8] sm:$0xff]   ;;  %v1299_v62 = vld [vmem:[#allocation2 + $0x100] sm:$0xff]  }
  0x1f   :  { %1154 = vmatpush3.bf16.msra.mxu1 %v1264_v11  ;;  %1133 = vmatprep.subr.bf16.mxu0 %v1265_v12  ;;  %v1285_v38 = vld [vmem:[%s1556_s0] ss:$16 sps:$4 sm:$0xff]   ;;  %v1293_v43 = vld [vmem:[%s1556_s0 + $0x4] ss:$16 sps:$4 sm:$0xff]   ;;  %v1301_v4 = vld [vmem:[#allocation2 + $0x148] sm:$0xff]  }
  0x20   :  { %1155 = vmatprep.subr.bf16.mxu1 %v1266_v13  ;;  %v1287_v39 = vld [vmem:[%s1556_s0 + $0x20] ss:$16 sps:$4 sm:$0xff]   ;;  %v78_v42 = vrot.slane %v1285_v38, %v1448_v37  ;;  %v1294_v44 = vld [vmem:[%s1556_s0 + $0x24] ss:$16 sps:$4 sm:$0xff]   ;;  %v85_v50 = vrot.slane %v1293_v43, %v1448_v37  ;;  %v1302_v7 = vld [vmem:[#allocation2 + $0x1c8] sm:$0xff]  }
  0x21   :  { %v1289_v40 = vld [vmem:[%s1556_s0 + $0x40] ss:$16 sps:$4 sm:$0xff]   ;;  %v1295_v45 = vld [vmem:[%s1556_s0 + $0x44] ss:$16 sps:$4 sm:$0xff]   ;;  %v92_v46 = vrot.slane %v1287_v39, %v1448_v37  ;;  %v99_v51 = vrot.slane %v1294_v44, %v1448_v37  ;;  %v1303_v8 = vld [vmem:[#allocation2 + $0x108] sm:$0xff]  }
  0x22   :  { %1134 = vmatpush3.bf16.msra.mxu0 %v1267_v14  ;;  %v1291_v41 = vld [vmem:[%s1556_s0 + $0x60] ss:$16 sps:$4 sm:$0xff]   ;;  %v150_v47 = vrot.slane %v1289_v40, %v1448_v37  ;;  %v1296_v49 = vld [vmem:[%s1556_s0 + $0x64] ss:$16 sps:$4 sm:$0xff]   ;;  %v157_v52 = vrot.slane %v1295_v45, %v1448_v37  ;;  %v1304_v9 = vld [vmem:[#allocation2 + $0x188] sm:$0xff]  }
  0x23   :  { %1156 = vmatpush3.bf16.msra.mxu1 %v1268_v15  ;;  %1135 = vmatprep.subr.bf16.mxu0 %v1269_v16  ;;  %v164_v48 = vrot.slane %v1291_v41, %v1448_v37  ;;  %v101_v54 = vcombine.high %v78_v42, %v92_v46  ;;  %v171_v56 = vrot.slane %v1296_v49, %v1448_v37  ;;  %v1300_v2 = vld [vmem:[#allocation2 + $0x180] sm:$0xff]   ;;  %v1305_v10 = vld [vmem:[#allocation2 + $0x150] sm:$0xff]   ;;  %v1309_v14 = vld [vmem:[#allocation2 + $0x158] sm:$0xff]  }
  0x24   :  { %1157 = vmatprep.subr.bf16.mxu1 %v1270_v17  ;;  %v100_v57 = vcombine.low %v78_v42, %v92_v46  ;;  %v103_v59 = vcombine.high %v85_v50, %v99_v51  ;;  %v102_v61 = vcombine.low %v85_v50, %v99_v51  ;;  %v1306_v11 = vld [vmem:[#allocation2 + $0x1d0] sm:$0xff]   ;;  %v1310_v15 = vld [vmem:[#allocation2 + $0x1d8] sm:$0xff]   ;;  %v1320_v25 = vld [vmem:[#allocation2 + $0x1a8] sm:$0xff]  }
  0x25   :  { %v173_v55 = vcombine.high %v150_v47, %v164_v48  ;;  %v172_v60 = vcombine.low %v150_v47, %v164_v48  ;;  %v175_v0 = vcombine.high %v157_v52, %v171_v56  ;;  %v174_v1 = vcombine.low %v157_v52, %v171_v56  ;;  %v1307_v12 = vld [vmem:[#allocation2 + $0x110] sm:$0xff]   ;;  %v1311_v16 = vld [vmem:[#allocation2 + $0x118] sm:$0xff]  }
  0x26   :  { %1136 = vmatpush3.bf16.msra.mxu0 %v1271_v18  ;;  %v1308_v13 = vld [vmem:[#allocation2 + $0x190] sm:$0xff]   ;;  %v1312_v17 = vld [vmem:[#allocation2 + $0x198] sm:$0xff]   ;;  %v1313_v18 = vld [vmem:[#allocation2 + $0x160] sm:$0xff]  }
  0x27   :  { %1158 = vmatpush3.bf16.msra.mxu1 %v1272_v19  ;;  %1137 = vmatprep.subr.bf16.mxu0 %v1273_v20  ;;  %v229_v63 = vpack.c.bf16 %v173_v55, %v101_v54  ;;  %v228_v3 = vpack.c.bf16 %v172_v60, %v100_v57  ;;  %v231_v5 = vpack.c.bf16 %v175_v0, %v103_v59  ;;  %v1314_v19 = vld [vmem:[#allocation2 + $0x1e0] sm:$0xff]   ;;  %v1321_v26 = vld [vmem:[#allocation2 + $0x170] sm:$0xff]   ;;  %v1327_v32 = vld [vmem:[#allocation2 + $0x138] sm:$0xff]  }
  0x28   :  { %1159 = vmatprep.subr.bf16.mxu1 %v1274_v21  ;;  %v230_v6 = vpack.c.bf16 %v174_v1, %v102_v61  ;;  %v1315_v20 = vld [vmem:[#allocation2 + $0x120] sm:$0xff]   ;;  %v1322_v27 = vld [vmem:[#allocation2 + $0x1f0] sm:$0xff]   ;;  %v1328_v33 = vld [vmem:[#allocation2 + $0x1b8] sm:$0xff]  }
  0x29   :  { %787 = vmatprep.mubr.bf16.mxu0 %v229_v63  ;;  %828 = vmatprep.mubr.bf16.mxu1 %v231_v5  ;;  %v1316_v21 = vld [vmem:[#allocation2 + $0x1a0] sm:$0xff]   ;;  %v1335_v38 = vld [vmem:[%s1556_s0 + $0x68] ss:$16 sps:$4 sm:$0xff]   ;;  %v1337_v39 = vld [vmem:[%s1556_s0 + $0xc] ss:$16 sps:$4 sm:$0xff]  }
  0x2a   :  { %1138 = vmatpush3.bf16.msra.mxu0 %v1275_v22  ;;  %v1317_v22 = vld [vmem:[#allocation2 + $0x168] sm:$0xff]   ;;  %v200_v46 = vrot.slane %v1335_v38, %v1448_v37  ;;  %v121_v47 = vrot.slane %v1337_v39, %v1448_v37  ;;  %v1341_v63 = vld [vmem:[%s1559_s3] sm:$0xff]   ;;  %v1343_v1 = vld [vmem:[%s1559_s3 + $0x10] sm:$0xff]  }
  0x2b   :  { %1160 = vmatpush3.bf16.msra.mxu1 %v1276_v23  ;;  %1139 = vmatprep.subr.bf16.mxu0 %v1277_v24  ;;  %v1318_v23 = vld [vmem:[#allocation2 + $0x1e8] sm:$0xff]   ;;  %v1347_v5 = vld [vmem:[%s1559_s3 + $0x30] sm:$0xff]  }
  0x2c   :  { %1161 = vmatprep.subr.bf16.mxu1 %v1278_v28  ;;  %v1319_v24 = vld [vmem:[#allocation2 + $0x128] sm:$0xff]   ;;  %v1323_v28 = vld [vmem:[#allocation2 + $0x130] sm:$0xff]  }
  0x2d   :  { %v1338_v40 = vld [vmem:[%s1556_s0 + $0x2c] ss:$16 sps:$4 sm:$0xff]  }
  0x2e   :  { %1140 = vmatpush3.bf16.msra.mxu0 %v1279_v29  ;;  %v1324_v29 = vld [vmem:[#allocation2 + $0x1b0] sm:$0xff]   ;;  %v1339_v44 = vld [vmem:[%s1556_s0 + $0x4c] ss:$16 sps:$4 sm:$0xff]   ;;  %v135_v48 = vrot.slane %v1338_v40, %v1448_v37 }
  0x2f   :  { %1162 = vmatpush3.bf16.msra.mxu1 %v1280_v30  ;;  %1141 = vmatprep.subr.bf16.mxu0 %v1281_v31  ;;  %v1325_v30 = vld [vmem:[#allocation2 + $0x178] sm:$0xff]   ;;  %v193_v50 = vrot.slane %v1339_v44, %v1448_v37  ;;  %v1342_v0 = vld [vmem:[%s1559_s3 + $0x8] sm:$0xff]   ;;  %v1118_v44 = vld [vmem:[%s1560_s4] ss:$0 sm:$0xff] }
  0x30   :  { %1163 = vmatprep.subr.bf16.mxu1 %v1282_v34  ;;  %v1326_v31 = vld [vmem:[#allocation2 + $0x1f8] sm:$0xff]   ;;  %v139_v54 = vcombine.high %v121_v47, %v135_v48  ;;  %v138_v56 = vcombine.low %v121_v47, %v135_v48 }
  0x31   :  { %v1329_v34 = vld [vmem:[%s1556_s0 + $0x8] ss:$16 sps:$4 sm:$0xff]   ;;  %v1340_v45 = vld [vmem:[%s1556_s0 + $0x6c] ss:$16 sps:$4 sm:$0xff]  }
  0x32   :  { %1142 = vmatpush3.bf16.msra.mxu0 %v1283_v35  ;;  %v1331_v35 = vld [vmem:[%s1556_s0 + $0x28] ss:$16 sps:$4 sm:$0xff]   ;;  %v114_v41 = vrot.slane %v1329_v34, %v1448_v37  ;;  %v207_v51 = vrot.slane %v1340_v45, %v1448_v37 }
  0x33   :  { %1164 = vmatpush3.bf16.msra.mxu1 %v1284_v36  ;;  %1171 = vmatprep.subr.bf16.mxu0 %v1297_v53  ;;  %v1333_v36 = vld [vmem:[%s1556_s0 + $0x48] ss:$16 sps:$4 sm:$0xff]   ;;  %v128_v42 = vrot.slane %v1331_v35, %v1448_v37 }
  0x34   :  { %1193 = vmatprep.subr.bf16.mxu1 %v1298_v58  ;;  %v186_v43 = vrot.slane %v1333_v36, %v1448_v37  ;;  %v211_v57 = vcombine.high %v193_v50, %v207_v51  ;;  %v210_v58 = vcombine.low %v193_v50, %v207_v51  ;;  %v1401_v37 = vmov 0.0  }
  0x35   :  { %788 = vmatmul.mubr.bf16.vlgmr.msra.gmra.mrb[0].mxu0 %v228_v3  ;;  %v137_v49 = vcombine.high %v114_v41, %v128_v42  ;;  %v136_v52 = vcombine.low %v114_v41, %v128_v42  ;;  %v1345_v3 = vld [vmem:[%s1559_s3 + $0x20] sm:$0xff]  }
  0x36   :  { %1172 = vmatpush3.bf16.msra.mxu0 %v1299_v62  ;;  %829 = vmatmul.mubr.bf16.vlgmr.msra.gmra.mrb[0].mxu1 %v230_v6  ;;  %v209_v53 = vcombine.high %v186_v43, %v200_v46  ;;  %v208_v55 = vcombine.low %v186_v43, %v200_v46  ;;  %v235_v61 = vpack.c.bf16 %v211_v57, %v139_v54  ;;  %v1348_v6 = vld [vmem:[%s1559_s3 + $0x38] sm:$0xff]  }
  0x37   :  { %1173 = vmatprep.subr.bf16.mxu0 %v1301_v4  ;;  %1194 = vmatpush3.bf16.msra.mxu1 %v1300_v2  ;;  %v234_v62 = vpack.c.bf16 %v210_v58, %v138_v56  ;;  %v1344_v2 = vld [vmem:[%s1559_s3 + $0x18] sm:$0xff]   ;;  %v1346_v4 = vld [vmem:[%s1559_s3 + $0x28] sm:$0xff]  }
  0x38   :  { %1195 = vmatprep.subr.bf16.mxu1 %v1302_v7  ;;  %v233_v59 = vpack.c.bf16 %v209_v53, %v137_v49  ;;  %v232_v60 = vpack.c.bf16 %v208_v55, %v136_v52  ;;  %910 = vmatprep.mubr.bf16.mxu1 %v235_v61 }
  0x3a   :  { %1174 = vmatpush3.bf16.msra.mxu0 %v1303_v8  ;;  %869 = vmatprep.mubr.bf16.mxu0 %v233_v59  ;;  %v1053_v8 = vld [vmem:[%s1558_s2] ss:$0 sm:$0xff] }
  0x3b   :  { %1175 = vmatprep.subr.bf16.mxu0 %v1305_v10  ;;  %1196 = vmatpush3.bf16.msra.mxu1 %v1304_v9 }
  0x3c   :  { %1197 = vmatprep.subr.bf16.mxu1 %v1306_v11 }
  0x3e   :  { %1176 = vmatpush3.bf16.msra.mxu0 %v1307_v12 }
  0x3f   :  { %1177 = vmatprep.subr.bf16.mxu0 %v1309_v14  ;;  %1198 = vmatpush3.bf16.msra.mxu1 %v1308_v13 }
  0x40   :  { %1199 = vmatprep.subr.bf16.mxu1 %v1310_v15 }
  0x42   :  { %1178 = vmatpush3.bf16.msra.mxu0 %v1311_v16 }
  0x43   :  { %1179 = vmatprep.subr.bf16.mxu0 %v1313_v18  ;;  %1200 = vmatpush3.bf16.msra.mxu1 %v1312_v17 }
  0x44   :  { %1201 = vmatprep.subr.bf16.mxu1 %v1314_v19 }
  0x46   :  { %1180 = vmatpush3.bf16.msra.mxu0 %v1315_v20 }
  0x47   :  { %1181 = vmatprep.subr.bf16.mxu0 %v1317_v22  ;;  %1202 = vmatpush3.bf16.msra.mxu1 %v1316_v21 }
  0x48   :  { %1203 = vmatprep.subr.bf16.mxu1 %v1318_v23 }
  0x4a   :  { %1182 = vmatpush3.bf16.msra.mxu0 %v1319_v24 }
  0x4b   :  { %1183 = vmatprep.subr.bf16.mxu0 %v1321_v26  ;;  %1204 = vmatpush3.bf16.msra.mxu1 %v1320_v25 }
  0x4c   :  { %1205 = vmatprep.subr.bf16.mxu1 %v1322_v27 }
  0x4e   :  { %1184 = vmatpush3.bf16.msra.mxu0 %v1323_v28 }
  0x4f   :  { %1185 = vmatprep.subr.bf16.mxu0 %v1325_v30  ;;  %1206 = vmatpush3.bf16.msra.mxu1 %v1324_v29 }
  0x50   :  { %1207 = vmatprep.subr.bf16.mxu1 %v1326_v31 }
  0x52   :  { %1186 = vmatpush3.bf16.msra.mxu0 %v1327_v32 }
  0x53   :  { %1208 = vmatpush3.bf16.msra.mxu1 %v1328_v33  ;;  %1224 = vmatprep.subr.bf16.mxu0 %v1401_v37 }
  0x55   :  { %870 = vmatmul.mubr.bf16.vlgmr.msra.gmra.mrb[4].mxu0 %v232_v60 }
  0x56   :  { %911 = vmatmul.mubr.bf16.vlgmr.msra.gmra.mrb[4].mxu1 %v234_v62  ;;  %1225 = vmatpush3.bf16.msra.mxu0 %v1341_v63 }
  0x57   :  { %1226 = vmatprep.subr.bf16.mxu0 %v1401_v37  ;;  %1240 = vmatprep.mubr.msk.bf16.mxu0 %vm1402_vm0, %v1401_v37 }
  0x5a   :  { %1227 = vmatpush3.bf16.msra.mxu0 %v1342_v0 }
  0x5b   :  { %1228 = vmatprep.subr.bf16.mxu0 %v1401_v37 }
  0x5e   :  { %1229 = vmatpush3.bf16.msra.mxu0 %v1343_v1 }
  0x5f   :  { %1230 = vmatprep.subr.bf16.mxu0 %v1401_v37 }
  0x62   :  { %1231 = vmatpush3.bf16.msra.mxu0 %v1344_v2 }
  0x63   :  { %1232 = vmatprep.subr.bf16.mxu0 %v1401_v37 }
  0x66   :  { %1233 = vmatpush3.bf16.msra.mxu0 %v1345_v3 }
  0x67   :  { %1234 = vmatprep.subr.bf16.mxu0 %v1401_v37 }
  0x6a   :  { %1235 = vmatpush3.bf16.msra.mxu0 %v1346_v4 }
  0x6b   :  { %1236 = vmatprep.subr.bf16.mxu0 %v1401_v37 }
  0x6e   :  { %1237 = vmatpush3.bf16.msra.mxu0 %v1347_v5 }
  0x6f   :  { %1238 = vmatprep.subr.bf16.mxu0 %v1401_v37 }
  0x72   :  { %1239 = vmatpush3.bf16.msra.mxu0 %v1348_v6 }
 0x108   :  { %v1143_v7 = vpop.f32.mrb[0].mxu0 }
 0x109   :  { %v1144_v9 = vpop.f32.mrb[1].mxu0  ;;  %v1165_v10 = vpop.f32.mrb[0].mxu1 }
 0x10a   :  { %v1145_v11 = vadd.f32 %v1144_v9, %v1143_v7  ;;  %v1146_v12 = vpop.f32.mrb[2].mxu0  ;;  %v1166_v13 = vpop.f32.mrb[1].mxu1 }
 0x10b   :  { %v1147_v14 = vpop.f32.mrb[3].mxu0  ;;  %v1167_v16 = vadd.f32 %v1166_v13, %v1165_v10  ;;  %v1168_v17 = vpop.f32.mrb[2].mxu1 }
 0x10c   :  { %v790_v15 = vadd.f32 %v1145_v11, %v1053_v8  ;;  %v1148_v18 = vadd.f32 %v1147_v14, %v1146_v12  ;;  %v1169_v19 = vpop.f32.mrb[3].mxu1 }
 0x10d   :  { %v1170_v22 = vadd.f32 %v1169_v19, %v1168_v17 }
 0x10e   :  { %v831_v20 = vadd.f32 %v1167_v16, %v790_v15  ;;  %v793_v21 = vadd.f32 %v1148_v18, %v1053_v8 }
 0x110   :  { %v834_v23 = vadd.f32 %v1170_v22, %v793_v21 }
 0x128   :  { %v1187_v24 = vpop.f32.mrb[4].mxu0 }
 0x129   :  { %v1209_v25 = vpop.f32.mrb[4].mxu1  ;;  %v1188_v26 = vpop.f32.mrb[5].mxu0 }
 0x12a   :  { %v1189_v27 = vadd.f32 %v1188_v26, %v1187_v24  ;;  %v1210_v28 = vpop.f32.mrb[5].mxu1  ;;  %v1190_v29 = vpop.f32.mrb[6].mxu0 }
 0x12b   :  { %v1211_v30 = vadd.f32 %v1210_v28, %v1209_v25  ;;  %v1212_v31 = vpop.f32.mrb[6].mxu1  ;;  %v1191_v32 = vpop.f32.mrb[7].mxu0 }
 0x12c   :  { %v872_v33 = vadd.f32 %v1189_v27, %v831_v20  ;;  %v1192_v34 = vadd.f32 %v1191_v32, %v1190_v29  ;;  %v1213_v35 = vpop.f32.mrb[7].mxu1 }
 0x12d   :  { %v1214_v36 = vadd.f32 %v1213_v35, %v1212_v31 }
 0x12e   :  { %v913_v38 = vadd.f32 %v1211_v30, %v872_v33  ;;  %v875_v39 = vadd.f32 %v1192_v34, %v834_v23 }
 0x130   :  { %v916_v40 = vadd.f32 %v1214_v36, %v875_v39  ;;  %v919_v41 = vmax.f32 %v913_v38, 0.0 }
 0x132   :  { %v920_v42 = vmax.f32 %v916_v40, 0.0 }
 0x134   :  { %v921_v43 = vpack.c.bf16 %v920_v42, %v919_v41 }
 0x136   :  { %1241 = vmatmul.mubr.bf16.vlgmr.msra.gmra.mrb[8].mxu0 %v921_v43 }
 0x209   :  { %v1027_v45 = vpop.f32.mrb[8].mxu0 }
 0x20a   :  { %v1028_v46 = vadd.f32 %v1118_v44, %v1027_v45  ;;  %v1242_v47 = vpop.f32.mrb[9].mxu0 }
 0x20b   :  { %v1030_v48 = vpop.f32.mrb[10].mxu0 }
 0x20c   :  { %1034 = vst [vmem:[#allocation5] sm:$0xff] %v1028_v46  ;;  %v1031_v49 = vadd.f32 %v1118_v44, %v1030_v48  ;;  %v1243_v50 = vpop.f32.mrb[11].mxu0 }
 0x20e   :  { %1035 = vst [vmem:[#allocation5 + $0x8] sm:$0xff] %v1031_v49 }
 0x20f   :  { %1040 = vsyncadd [#allocation4], 224  ;;  %s1403_s29 = smov [#allocation5]  }
 0x210   :  { %s1041_s30 = sshll.u32 %s1403_s29, 4  ;;  %s1042_s30 = int_to_ptr.vmem [resolvable:$true] %s1041_s30 }
 0x211   :  { %s1371_s6 = scalar_lea.vmem %s1042_s30, 32  ;;  %s1375_s1 = scalar_lea.vmem %s1042_s30, 256 }
 0x212   :  { %p1372_p8 = scmp.ne.s32.totalorder %s1042_s30, %s1371_s6  ;;  %p1376_p9 = scmp.lt.s32.totalorder %s1042_s30, %s1042_s30 }
 0x213   :  { %p1377_p10 = scmp.lt.s32.totalorder %s1375_s1, %s1371_s6 }
 0x215   :  { %p1378_p11 = por %p1377_p10, %p1376_p9 }
 0x217   :  { %p1379_p12 = pnand %p1378_p11, %p1372_p8 }
 0x219   :  { %1382 = shalt.err (!%p1379_p12)
}
 0x21a   :  { %s1383_s8 = scalar_lea.hbm %s1561_s5, 32 }
 0x21b   :  { %p1384_p13 = scmp.ne.s32.totalorder %s1561_s5, %s1383_s8  ;;  %p1387_p0 = scmp.lt.u32.totalorder %s1383_s8, %s1561_s5 }
 0x21d   :  { %p1389_p1 = pnand %p1387_p0, %p1384_p13 }
 0x21f   :  { %1392 = shalt.err (!%p1389_p1)
}
 0x220   :  { %s1404_s12 = smov 32   ;;  %s1405_s13 = smov 2  }
 0x221   :  { %1047 = dma.vmem_to_hbm [thread:$0]  %s1042_s30, 32, %s1561_s5, [#allocation4], %s1404_s12, %s1404_s12, %s1405_s13  }
 0x222   :  { %1395 = dma.done.wait [#allocation4], 256  }
 0x223   :  { %1396 = vsyncadd [#allocation4], 4294967040 }
 0x224   :  { %1051 = vsyncpa [#allocation3], 1 }
 0x225   :  { %1052 = vsyncpa [#allocation4], 1 }

</bundles_post_ra>
